<compile_context>
chip_gen: v7x
topology: tpu7x:2x2x1
jax: 0.10.0
libtpu: 0.0.40
codegen_flags: <defaults>
</compile_context>

<pallas_src>
import jax
import jax.numpy as jnp
from jax.experimental import pallas as pl
from jax.experimental.pallas import tpu as pltpu

_LANE = 128
_TARGET_BLOCK_BYTES = 4 * 1024 * 1024     # ~4 MiB per input tile
_VMEM_LIMIT_BYTES = 48 * 1024 * 1024      # safe on v5e/v6e (128 MiB) and v7x (64 MiB)


def _drop_path_kernel(mask_ref, x_ref, o_ref):
    # mask_ref: (tile_n, 1, 1) or (n, 1) — broadcasts over the feature tile.
    # x_ref/o_ref: (tile_n, tile_r, 128) or (n, tile_f), same dtype as x.
    o_ref[...] = x_ref[...] * mask_ref[...]


def _sample_mask(key, n, keep_prob, scale, dtype):
    """Per-sample mask in x's dtype: `scale` (=1/keep_prob or 1) kept, 0 dropped."""
    keep = jax.random.bernoulli(key, p=keep_prob, shape=(n,))
    return jnp.where(keep, jnp.float32(scale), jnp.float32(0.0)).astype(dtype)


def drop_path(x, drop_prob: float, key, *, training: bool = True,
              scale_by_keep: bool = True):
    """Pallas implementation of timm-style drop_path for NCHW (or any-rank) x."""
    if drop_prob == 0.0 or not training:
        return x

    keep_prob = 1.0 - drop_prob
    scale = (1.0 / keep_prob) if (scale_by_keep and keep_prob > 0.0) else 1.0

    n = x.shape[0]
    flat = x.reshape(n, -1)
    f = flat.shape[1]
    itemsize = flat.dtype.itemsize
    mask = _sample_mask(key, n, keep_prob, scale, flat.dtype)

    cost = pl.CostEstimate(flops=n * f, transcendentals=0,
                           bytes_accessed=2 * n * f * itemsize)

    if f % _LANE == 0:
        # --- Sublane-dense 3D path: (N, R, 128), blocks (tile_n, tile_r, 128) ---
        r = f // _LANE
        xr = flat.reshape(n, r, _LANE)
        mask_r = mask.reshape(n, 1, 1)

        # Sublane packing granularity: 8 rows for 4-byte, 16 for 2-byte dtypes.
        sub = max(8, 32 // itemsize)
        row_bytes = _LANE * itemsize

        budget_r = _TARGET_BLOCK_BYTES // max(n * row_bytes, 1)
        tile_r = (budget_r // sub) * sub
        if tile_r == 0:
            # Very large batch: a single sub-row slab over all N exceeds the
            # budget, so tile the batch axis as well.
            tile_r = min(r, sub)
            tile_n = min(n, max(1, _TARGET_BLOCK_BYTES // (tile_r * row_bytes)))
        else:
            tile_r = min(tile_r, r)
            tile_n = n

        grid = (pl.cdiv(n, tile_n), pl.cdiv(r, tile_r))
        out = pl.pallas_call(
            _drop_path_kernel,
            out_shape=jax.ShapeDtypeStruct((n, r, _LANE), flat.dtype),
            grid=grid,
            in_specs=[
                pl.BlockSpec((tile_n, 1, 1), lambda i, j: (i, 0, 0)),
                pl.BlockSpec((tile_n, tile_r, _LANE), lambda i, j: (i, j, 0)),
            ],
            out_specs=pl.BlockSpec((tile_n, tile_r, _LANE), lambda i, j: (i, j, 0)),
            compiler_params=pltpu.CompilerParams(
                dimension_semantics=("parallel", "parallel"),
                vmem_limit_bytes=_VMEM_LIMIT_BYTES,
            ),
            cost_estimate=cost,
        )(mask_r, xr)
        return out.reshape(x.shape)

    # --- Fallback 2D path (F not a multiple of 128): lane-dense (N, F) blocks ---
    mask_c = mask.reshape(n, 1)
    tile_f = max(_LANE,
                 (_TARGET_BLOCK_BYTES // max(n * itemsize, 1)) // _LANE * _LANE)
    if tile_f >= f:
        tile_f = f  # single full-extent block
    grid = (pl.cdiv(f, tile_f),)
    out = pl.pallas_call(
        _drop_path_kernel,
        out_shape=jax.ShapeDtypeStruct((n, f), flat.dtype),
        grid=grid,
        in_specs=[
            pl.BlockSpec((n, 1), lambda i: (0, 0)),
            pl.BlockSpec((n, tile_f), lambda i: (0, i)),
        ],
        out_specs=pl.BlockSpec((n, tile_f), lambda i: (0, i)),
        compiler_params=pltpu.CompilerParams(
            dimension_semantics=("parallel",),
            vmem_limit_bytes=_VMEM_LIMIT_BYTES,
        ),
        cost_estimate=cost,
    )(mask_c, flat)
    return out.reshape(x.shape)


class DropPath:
    """JAX/Pallas mirror of the PyTorch DropPath module."""

    def __init__(self, drop_prob: float = 0.0, scale_by_keep: bool = True):
        self.drop_prob = drop_prob
        self.scale_by_keep = scale_by_keep
        self.training = True

    def __call__(self, x, key):
        # TODO(synk): PyTorch uses an implicit global RNG + self.training; here
        # the RNG key is explicit (JAX-style) and `training` is a module flag.
        return drop_path(x, self.drop_prob, key,
                         training=self.training,
                         scale_by_keep=self.scale_by_keep)


if __name__ == "__main__":
    key = jax.random.PRNGKey(0)
    kx, kmask = jax.random.split(key)

    # Small NCHW input: batch=2, channels=4, spatial=16x16.
    x = jax.random.normal(kx, (2, 4, 16, 16), dtype=jnp.float32)

    module = DropPath(drop_prob=0.25, scale_by_keep=True)

    # Training-mode forward (the Pallas hot path).
    y_train = jax.block_until_ready(module(x, kmask))
    assert y_train.shape == x.shape and y_train.dtype == x.dtype

    # Semantic check: every sample is either all-zeros or x * (1/keep_prob),
    # and the mask is consistent across all features of a sample.
    keep_prob = 1.0 - module.drop_prob
    n = x.shape[0]
    y2 = y_train.reshape(n, -1)
    x2 = x.reshape(n, -1)
    scaled = x2 * jnp.float32(1.0 / keep_prob)
    is_zero = jnp.all(y2 == 0.0, axis=1)
    is_scaled = jnp.all(jnp.abs(y2 - scaled) <= 1e-5 * (1.0 + jnp.abs(scaled)), axis=1)
    assert bool(jnp.all(is_zero | is_scaled)), "per-sample mask semantics violated"

    # Eval mode: identity.
    module.training = False
    y_eval = jax.block_until_ready(module(x, kmask))
    assert jnp.allclose(y_eval, x)

    print("KERNEL_OK")
</pallas_src>

<mosaic_0001>
module attributes {stable_mosaic.version = 11 : i64} {
  func.func @_drop_path_kernel(%arg0: i32, %arg1: i32, %arg2: memref<2x1x1xf32, #tpu.memory_space<vmem>>, %arg3: memref<2x8x128xf32, #tpu.memory_space<vmem>>, %arg4: memref<2x8x128xf32, #tpu.memory_space<vmem>>) attributes {dimension_semantics = [#tpu.dimension_semantics<parallel>, #tpu.dimension_semantics<parallel>], iteration_bounds = array<i64: 1, 1>, scalar_prefetch = 0 : i64, scratch_operands = 0 : i64, tpu.core_type = #tpu.core_type<tc>, window_params = [{transform_indices = @transform_0, window_bounds = array<i64: 2, 1, 1>}, {transform_indices = @transform_1, window_bounds = array<i64: 2, 8, 128>}, {transform_indices = @transform_2, window_bounds = array<i64: 2, 8, 128>}]} {
    %c0 = arith.constant 0 : index
    %c0_0 = arith.constant 0 : index
    %c0_1 = arith.constant 0 : index
    %0 = vector.load %arg3[%c0, %c0_0, %c0_1] : memref<2x8x128xf32, #tpu.memory_space<vmem>>, vector<2x8x128xf32>
    %c0_2 = arith.constant 0 : index
    %c0_3 = arith.constant 0 : index
    %c0_4 = arith.constant 0 : index
    %1 = vector.load %arg2[%c0_2, %c0_3, %c0_4] : memref<2x1x1xf32, #tpu.memory_space<vmem>>, vector<2x1x1xf32>
    %2 = vector.broadcast %1 : vector<2x1x1xf32> to vector<2x8x128xf32>
    %3 = arith.mulf %0, %2 : vector<2x8x128xf32>
    %c0_5 = arith.constant 0 : index
    %c0_6 = arith.constant 0 : index
    %c0_7 = arith.constant 0 : index
    %4 = vector.load %arg4[%c0_5, %c0_6, %c0_7] : memref<2x8x128xf32, #tpu.memory_space<vmem>>, vector<2x8x128xf32>
    tpu.vector_store %arg4[%c0_5, %c0_6, %c0_7], %3 {strides = array<i32>} : memref<2x8x128xf32, #tpu.memory_space<vmem>>, vector<2x8x128xf32>,
    return
  }
  func.func @transform_0(%arg0: i32, %arg1: i32) -> (i32, i32, i32) {
    %c0_i32 = arith.constant 0 : i32
    %c0_i32_0 = arith.constant 0 : i32
    %c0_i32_1 = arith.constant 0 : i32
    return %arg0, %c0_i32, %c0_i32_0 : i32, i32, i32
  }
  func.func @transform_1(%arg0: i32, %arg1: i32) -> (i32, i32, i32) {
    %c0_i32 = arith.constant 0 : i32
    %c0_i32_0 = arith.constant 0 : i32
    return %arg0, %arg1, %c0_i32 : i32, i32, i32
  }
  func.func @transform_2(%arg0: i32, %arg1: i32) -> (i32, i32, i32) {
    %c0_i32 = arith.constant 0 : i32
    %c0_i32_0 = arith.constant 0 : i32
    return %arg0, %arg1, %c0_i32 : i32, i32, i32
  }
}

</mosaic_0001>

<bundles_post_ra>
// kernel: tpu_custom_call.1
= control target key start
LH: loop header
LB: loop body
LE: loop exit
PB: predicated region body
PF: predicated region fallthrough
CT: control target
= control target key end

     0   :  { %7 = vsyncpa [#allocation3], 0  ;;  %s181_s0 = inlined_call_operand.vmem [shape: f32[2,1,1], index: 0, kind: input, shape index: {}]   ;;  %s182_s1 = inlined_call_operand.hbm [shape: f32[2,8,128], index: 1, kind: input, shape index: {}]   ;;  %s183_s2 = inlined_call_operand.hbm [shape: f32[2,8,128], index: 2, kind: output, shape index: {}]  }
   0x1   :  { %8 = vsyncpa [#allocation4], 0  ;;  %s125_s9 = smov [#allocation2]   ;;  %s77_s13 = scalar_lea.hbm %s182_s1, 256 }
   0x2   :  { %s16_s10 = sshll.u32 %s125_s9, 4  ;;  %p78_p0 = scmp.ne.s32.totalorder %s182_s1, %s77_s13  ;;  %s17_s10 = int_to_ptr.vmem [resolvable:$true] %s16_s10 }
   0x3   :  { %p81_p1 = scmp.lt.u32.totalorder %s77_s13, %s182_s1 }
   0x5   :  { %p83_p2 = pnand %p81_p1, %p78_p0 }
   0x7   :  { %86 = shalt.err (!%p83_p2)
}
   0x8   :  { %s87_s18 = scalar_lea.vmem %s17_s10, 256  ;;  %p92_p4 = scmp.lt.s32.totalorder %s17_s10, %s17_s10 }
   0x9   :  { %p88_p3 = scmp.ne.s32.totalorder %s17_s10, %s87_s18  ;;  %p93_p5 = scmp.lt.s32.totalorder %s87_s18, %s87_s18 }
   0xb   :  { %p94_p6 = por %p93_p5, %p92_p4 }
   0xd   :  { %p95_p7 = pnand %p94_p6, %p88_p3 }
   0xf   :  { %98 = shalt.err (!%p95_p7)
}
  0x10   :  { %s126_s19 = smov 128   ;;  %s127_s20 = smov 8  }
  0x11   :  { %22 = dma.hbm_to_vmem [thread:$0]  %s182_s1, 256, %s17_s10, [#allocation3], %s126_s19, %s126_s19, %s127_s20  }
  0x12   :  { %121 = dma.done.wait [#allocation3], 256  }
  0x13   :  { %122 = vsyncadd [#allocation3], 4294967040  ;;  %v128_v0 = vmov 0   ;;  %v69_v1 = vld [vmem:[%s181_s0] ss:$0 sm:$0xff]  ;;  %v27_v6 = vld [vmem:[#allocation2 + $0x8] sm:$0xff] }
  0x14   :  { %76 = vset.pattern.permute.xlu0 %v128_v0  ;;  %v70_v2 = vld [vmem:[%s181_s0 + $0x1] ss:$0 sm:$0xff]  ;;  %s129_s27 = smov [#allocation5]  }
  0x15   :  { %41 = vperm.xlu0 %76, %v69_v1   ;;  %v26_v3 = vld [vmem:[#allocation2] sm:$0xff]  ;;  %s57_s1 = sshll.u32 %s129_s27, 4  ;;  %s58_s1 = int_to_ptr.vmem [resolvable:$true] %s57_s1 }
  0x16   :  { %s99_s28 = scalar_lea.vmem %s58_s1, 256  ;;  %p104_p9 = scmp.lt.s32.totalorder %s58_s1, %s58_s1 }
  0x17   :  { %p100_p8 = scmp.ne.s32.totalorder %s58_s1, %s99_s28  ;;  %p105_p10 = scmp.lt.s32.totalorder %s99_s28, %s99_s28 }
  0x19   :  { %45 = vperm.xlu0 %76, %v70_v2   ;;  %p106_p11 = por %p105_p10, %p104_p9 }
  0x1b   :  { %p107_p12 = pnand %p106_p11, %p100_p8 }
  0x94   :  { %v42_v4 = vpop.permute.xlu0 %41 }
  0x95   :  { %v48_v5 = vmul.f32 %v42_v4, %v26_v3 }
  0x97   :  { %50 = vst [vmem:[#allocation5] sm:$0xff] %v48_v5 }
  0x98   :  { %v46_v7 = vpop.permute.xlu0 %45 }
  0x99   :  { %v49_v8 = vmul.f32 %v46_v7, %v27_v6 }
  0x9b   :  { %51 = vst [vmem:[#allocation5 + $0x8] sm:$0xff] %v49_v8 }
  0x9c   :  { %110 = shalt.err (!%p107_p12)
}
  0x9d   :  { %s111_s30 = scalar_lea.hbm %s183_s2, 256 }
  0x9e   :  { %p112_p13 = scmp.ne.s32.totalorder %s183_s2, %s111_s30  ;;  %p115_p0 = scmp.lt.u32.totalorder %s111_s30, %s183_s2 }
  0xa0   :  { %p117_p1 = pnand %p115_p0, %p112_p13 }
  0xa2   :  { %120 = shalt.err (!%p117_p1)
}
  0xa3   :  { %63 = dma.vmem_to_hbm [thread:$0]  %s58_s1, 256, %s183_s2, [#allocation4], %s126_s19, %s126_s19, %s127_s20  }
  0xa4   :  { %123 = dma.done.wait [#allocation4], 256  }
  0xa5   :  { %124 = vsyncadd [#allocation4], 4294967040 }
  0xa6   :  { %67 = vsyncpa [#allocation3], 1 }
  0xa7   :  { %68 = vsyncpa [#allocation4], 1 }

</bundles_post_ra>
